<compile_context>
chip_gen: v5e
topology: v5e:2x2
jax: 0.10.0
libtpu: 0.0.40
codegen_flags: <defaults>
</compile_context>

<pallas_src>
import math

import jax
import jax.numpy as jnp
from jax.experimental import pallas as pl
from jax.experimental.pallas import tpu as pltpu


def _elementwise_scale_kernel(w_ref, x_ref, o_ref):
    # w_ref: (1, TH); x_ref/o_ref: (TR, TH). Pure VPU broadcast multiply;
    # the kernel is HBM-bandwidth-bound, so DMA is the saturating unit.
    o_ref[...] = x_ref[...] * w_ref[...]


def _sublane_multiple(dtype) -> int:
    """Native sublane packing: 8 for 32-bit, 16 for bf16, 32 for int8/fp8."""
    bits = jnp.dtype(dtype).itemsize * 8
    return max(8, 256 // bits)


def _vmem_budget_bytes() -> int:
    """~3/8 of physical VMEM (48 MiB on 128-MiB chips, 24 MiB on v7x's 64 MiB)."""
    try:
        cap = int(pltpu.get_tpu_info().vmem_capacity_bytes)
    except Exception:
        cap = 64 << 20  # conservative fallback (v7x-sized VMEM)
    return (cap * 3) // 8


def _choose_tiles(rows: int, hidden: int, dtype, budget_bytes: int):
    """Pick (TR, TH) so double-buffered x + out tiles fit the VMEM budget."""
    # Hidden tile: full extent when small, else a 128-multiple (last j-block
    # is a masked partial block — fine for a streaming multiply).
    th = hidden if hidden <= 2048 else 2048

    dtype_bytes = jnp.dtype(dtype).itemsize
    # 2 (double buffer) * 2 (x tile + out tile) * TR * TH * bytes <= budget.
    max_tr = max(1, budget_bytes // (4 * th * dtype_bytes))
    tr = min(rows, max_tr)
    if tr < rows:
        sub = _sublane_multiple(dtype)
        tr = max(sub, (tr // sub) * sub)
    return tr, th


def elementwise_linear(x: jax.Array, w: jax.Array) -> jax.Array:
    """Computes w * x with w broadcast along the last axis of x."""
    orig_shape = x.shape
    hidden = orig_shape[-1]
    assert w.shape == (hidden,), f"w shape {w.shape} must be ({hidden},)"

    # Match PyTorch type promotion (e.g. fp32 w * bf16 x -> fp32).
    out_dtype = jnp.promote_types(x.dtype, w.dtype)
    x2d = x.reshape(-1, hidden).astype(out_dtype)
    wv = w.astype(out_dtype)
    rows = x2d.shape[0]

    # Lane-dense repack for small hidden: fold k = lcm(hidden,128)//hidden rows
    # into one so output stores are full 128-lane slabs (no masked vst.msk).
    packed_rows, packed_hidden, pad_rows, k = rows, hidden, 0, 1
    if hidden < 128:
        k = math.lcm(hidden, 128) // hidden
        pad_rows = (-rows) % k
        if pad_rows:
            x2d = jnp.pad(x2d, ((0, pad_rows), (0, 0)))
        packed_rows = (rows + pad_rows) // k
        packed_hidden = hidden * k
        x2d = x2d.reshape(packed_rows, packed_hidden)
        wv = jnp.tile(wv, k)

    budget = _vmem_budget_bytes()
    tr, th = _choose_tiles(packed_rows, packed_hidden, out_dtype, budget)
    grid = (pl.cdiv(packed_rows, tr), pl.cdiv(packed_hidden, th))

    w2d = wv.reshape(1, packed_hidden)

    dtype_bytes = jnp.dtype(out_dtype).itemsize
    cost = pl.CostEstimate(
        flops=packed_rows * packed_hidden,
        transcendentals=0,
        bytes_accessed=(2 * packed_rows * packed_hidden + packed_hidden) * dtype_bytes,
    )

    out2d = pl.pallas_call(
        _elementwise_scale_kernel,
        out_shape=jax.ShapeDtypeStruct((packed_rows, packed_hidden), out_dtype),
        grid_spec=pl.GridSpec(
            grid=grid,
            in_specs=[
                # w is tiny (<= th * itemsize per step); per-j DMA keeps partial
                # last blocks safely masked by the BlockSpec machinery.
                pl.BlockSpec((1, th), lambda i, j: (0, j)),
                pl.BlockSpec((tr, th), lambda i, j: (i, j)),
            ],
            out_specs=pl.BlockSpec((tr, th), lambda i, j: (i, j)),
        ),
        compiler_params=pltpu.CompilerParams(
            # No reduction anywhere: both axes parallel (v7x megacore freedom).
            dimension_semantics=("parallel", "parallel"),
            # Explicit scoped-VMEM limit: budget + headroom, generation-aware,
            # so v5e's 16 MiB default never forces a retile / compile failure.
            vmem_limit_bytes=int(budget + (4 << 20)),
        ),
        cost_estimate=cost,
    )(w2d, x2d)

    if k > 1:
        out2d = out2d.reshape(packed_rows * k, hidden)
        if pad_rows:
            out2d = out2d[:rows]
    return out2d.reshape(orig_shape)


if __name__ == "__main__":
    key = jax.random.PRNGKey(0)
    batch, seq, hidden = 2, 8, 32

    x = jax.random.normal(key, (batch, seq, hidden), dtype=jnp.float32)
    # Module init: torch.ones(input_size) -> deterministic ones.
    w = jnp.ones((hidden,), dtype=jnp.float32)

    y = elementwise_linear(x, w)
    jax.block_until_ready(y)

    # Reference check (pure JAX broadcast multiply).
    y_ref = w * x
    assert y.shape == x.shape
    assert y.dtype == y_ref.dtype
    assert jnp.allclose(y, y_ref, atol=1e-6), "mismatch vs reference"

    print("KERNEL_OK")
</pallas_src>

<mosaic_0001>
module attributes {stable_mosaic.version = 11 : i64} {
  func.func @_elementwise_scale_kernel(%arg0: i32, %arg1: i32, %arg2: memref<1x128xf32, #tpu.memory_space<vmem>>, %arg3: memref<4x128xf32, #tpu.memory_space<vmem>>, %arg4: memref<4x128xf32, #tpu.memory_space<vmem>>) attributes {dimension_semantics = [#tpu.dimension_semantics<parallel>, #tpu.dimension_semantics<parallel>], iteration_bounds = array<i64: 1, 1>, scalar_prefetch = 0 : i64, scratch_operands = 0 : i64, tpu.core_type = #tpu.core_type<tc>, window_params = [{transform_indices = @transform_0, window_bounds = array<i64: 1, 128>}, {transform_indices = @transform_1, window_bounds = array<i64: 4, 128>}, {transform_indices = @transform_2, window_bounds = array<i64: 4, 128>}]} {
    %c0 = arith.constant 0 : index
    %c0_0 = arith.constant 0 : index
    %0 = vector.load %arg3[%c0, %c0_0] : memref<4x128xf32, #tpu.memory_space<vmem>>, vector<4x128xf32>
    %c0_1 = arith.constant 0 : index
    %c0_2 = arith.constant 0 : index
    %1 = vector.load %arg2[%c0_1, %c0_2] : memref<1x128xf32, #tpu.memory_space<vmem>>, vector<1x128xf32>
    %2 = vector.broadcast %1 : vector<1x128xf32> to vector<4x128xf32>
    %3 = arith.mulf %0, %2 : vector<4x128xf32>
    %c0_3 = arith.constant 0 : index
    %c0_4 = arith.constant 0 : index
    %4 = vector.load %arg4[%c0_3, %c0_4] : memref<4x128xf32, #tpu.memory_space<vmem>>, vector<4x128xf32>
    tpu.vector_store %arg4[%c0_3, %c0_4], %3 {strides = array<i32>} : memref<4x128xf32, #tpu.memory_space<vmem>>, vector<4x128xf32>,
    return
  }
  func.func @transform_0(%arg0: i32, %arg1: i32) -> (i32, i32) {
    %c0_i32 = arith.constant 0 : i32
    %c0_i32_0 = arith.constant 0 : i32
    return %c0_i32, %arg1 : i32, i32
  }
  func.func @transform_1(%arg0: i32, %arg1: i32) -> (i32, i32) {
    %c0_i32 = arith.constant 0 : i32
    return %arg0, %arg1 : i32, i32
  }
  func.func @transform_2(%arg0: i32, %arg1: i32) -> (i32, i32) {
    %c0_i32 = arith.constant 0 : i32
    return %arg0, %arg1 : i32, i32
  }
}

</mosaic_0001>

<bundles_post_ra>
// kernel: tpu_custom_call.1
= control target key start
LH: loop header
LB: loop body
LE: loop exit
PB: predicated region body
PF: predicated region fallthrough
CT: control target
= control target key end

     0   :  { %7 = vsyncpa [#allocation3], 0  ;;  %s174_s0 = inlined_call_operand.hbm [shape: f32[1,128], index: 0, kind: input, shape index: {}]   ;;  %s175_s1 = inlined_call_operand.hbm [shape: f32[4,128], index: 1, kind: input, shape index: {}]   ;;  %s176_s2 = inlined_call_operand.hbm [shape: f32[4,128], index: 2, kind: output, shape index: {}]  }
   0x1   :  { %8 = vsyncpa [#allocation6], 0 }
   0x2   :  { %9 = vsyncpa [#allocation4], 0  ;;  %s15_s11 = sshll.u32 %s174_s0, 4  ;;  %s147_s12 = smov [#allocation2]   ;;  %s16_s11 = int_to_ptr.hbm [resolvable:$true] %s15_s11 }
   0x3   :  { %s17_s13 = sshll.u32 %s147_s12, 4  ;;  %s26_s16 = sshll.u32 %s175_s1, 4  ;;  %s18_s13 = int_to_ptr.vmem [resolvable:$true] %s17_s13  ;;  %s27_s16 = int_to_ptr.hbm [resolvable:$true] %s26_s16 }
   0x4   :  { %20 = dma.hbm_to_vmem [thread:$0]  %s16_s11, 16, %s18_s13, [#allocation3]  }
   0x5   :  { %s148_s17 = smov [#allocation5]  }
   0x6   :  { %s28_s18 = sshll.u32 %s148_s17, 4  ;;  %s29_s18 = int_to_ptr.vmem [resolvable:$true] %s28_s18 }
   0x7   :  { %31 = dma.hbm_to_vmem [thread:$0]  %s27_s16, 64, %s29_s18, [#allocation6]  }
   0x8   :  { %141 = dma.done.wait [#allocation3], 16  }
   0x9   :  { %142 = vsyncadd [#allocation3], 4294967280 }
   0xa   :  { %143 = dma.done.wait [#allocation6], 64  }
   0xb   :  { %144 = vsyncadd [#allocation6], 4294967232  ;;  %s149_s19 = smov [#allocation7]   ;;  %s54_s22 = sshll.u32 %s176_s2, 4  ;;  %v40_v0 = vld [vmem:[#allocation5] sm:$0xf]  ;;  %s55_s22 = int_to_ptr.hbm [resolvable:$true] %s54_s22 }
   0xc   :  { %s52_s0 = sshll.u32 %s149_s19, 4  ;;  %v68_v1 = vld [vmem:[#allocation2] ss:$0 sm:$0xff]  ;;  %s53_s0 = int_to_ptr.vmem [resolvable:$true] %s52_s0 }
   0xd   :  { %v45_v2 = vmul.f32 %v68_v1, %v40_v0 }
   0xf   :  { %46 = vst [vmem:[#allocation7] sm:$0xf] %v45_v2 }
  0x10   :  { %57 = dma.vmem_to_hbm [thread:$0]  %s53_s0, 64, %s55_s22, [#allocation4]  }
  0x11   :  { %145 = dma.done.wait [#allocation4], 64  }
  0x12   :  { %146 = vsyncadd [#allocation4], 4294967232 }
  0x13   :  { %62 = vsyncpa [#allocation3], 1 }
  0x14   :  { %63 = vsyncpa [#allocation6], 1 }
  0x15   :  { %64 = vsyncpa [#allocation4], 1 }

</bundles_post_ra>
